<compile_context>
chip_gen: v7x
topology: tpu7x:2x2x1
jax: 0.10.0
libtpu: 0.0.40
codegen_flags: <defaults>
</compile_context>

<pallas_src>
import functools

import jax
import jax.numpy as jnp
from jax.experimental import pallas as pl
from jax.experimental.pallas import tpu as pltpu

_LANES = 128


def _kld_partial_kernel(mu_ref, lv_ref, out_ref, acc_ref, *,
                        block_rows, n_inner, rows_total, need_mask, scale):
    """Accumulate scale * sum(1 + logvar - mu^2 - exp(logvar)) over one slice."""
    k = pl.program_id(1)  # inner (reduction) axis

    @pl.when(k == 0)
    def _():
        acc_ref[...] = jnp.zeros_like(acc_ref)

    mu = mu_ref[...].astype(jnp.float32)
    lv = lv_ref[...].astype(jnp.float32)

    if need_mask:
        # Ragged row tail / clamped duplicate blocks: zero out rows past the
        # true extent BEFORE exp so the per-element term is exactly 0 there.
        p = pl.program_id(0)
        logical_block = p * n_inner + k
        row_ids = logical_block * block_rows + jax.lax.broadcasted_iota(
            jnp.int32, mu.shape, 0)
        valid = row_ids < rows_total
        mu = jnp.where(valid, mu, 0.0)
        lv = jnp.where(valid, lv, 0.0)

    # Element-wise accumulate (VPU + EUP only) — no per-step cross-lane reduce.
    acc_ref[...] += (1.0 + lv) - mu * mu - jnp.exp(lv)

    @pl.when(k == pl.num_programs(1) - 1)
    def _():
        # One cross-lane/sublane reduce per slice, only in the epilogue.
        # Fold the -0.5 scale / reduction divisor here.
        total = jnp.sum(acc_ref[...]) * scale
        # Lane-dense (8, 128) output block; wrapper reads element [0, 0].
        out_ref[...] = jnp.full((8, _LANES), total, dtype=jnp.float32)


def kld_loss(mu, logvar, reduction='sum', *, target_block_bytes=2 << 20):
    """KLDLoss(reduction)(mu, logvar) — returns a scalar float32."""
    assert mu.shape == logvar.shape, (mu.shape, logvar.shape)

    batch = int(mu.shape[0])
    n_elems = 1
    for d in mu.shape:
        n_elems *= int(d)

    if reduction == 'sum':
        scale = -0.5
    elif reduction == 'batch':
        scale = -0.5 / batch
    elif reduction == 'mean':
        scale = -0.5 / n_elems
    else:
        raise ValueError(f"unknown reduction: {reduction}")

    mu_flat = mu.reshape(-1)
    lv_flat = logvar.reshape(-1)

    # Lane-dense slab: view the flattened tensor as (rows, 128).
    pad = (-n_elems) % _LANES
    if pad:
        # Zero-padding is exact for KLD: 1 + 0 - 0 - exp(0) = 0.  Only taken
        # when the flat length is not 128-aligned (otherwise zero-copy).
        mu_flat = jnp.pad(mu_flat, (0, pad))
        lv_flat = jnp.pad(lv_flat, (0, pad))
    rows = (n_elems + pad) // _LANES
    mu2 = mu_flat.reshape(rows, _LANES)
    lv2 = lv_flat.reshape(rows, _LANES)

    itemsize = jnp.dtype(mu.dtype).itemsize
    # Minimum sublane granularity: 8 rows for 4-byte dtypes, 16 for bf16, ...
    sub = 8 * max(1, 4 // itemsize)

    if rows < sub:
        block_rows = rows  # full-extent block (exempt from (8,128) rule)
    else:
        target_rows = max(sub, target_block_bytes // (_LANES * itemsize))
        block_rows = min((rows // sub) * sub, (target_rows // sub) * sub)
        block_rows = max(block_rows, sub)

    n_row_blocks = -(-rows // block_rows)  # cdiv

    # Split the row-blocks into two "parallel" slices so v7x's 2 TensorCores
    # each take half; on 1-TC chips this is just a sequential outer loop.
    n_par = 2 if n_row_blocks >= 4 else 1
    n_inner = -(-n_row_blocks // n_par)
    need_mask = (n_par * n_inner * block_rows) != rows
    last_block = n_row_blocks - 1

    def in_index_map(p, k):
        # Clamp so the DMA never starts past the array; fully-duplicated
        # blocks are zeroed by the in-kernel row mask.
        return (jnp.minimum(p * n_inner + k, last_block), 0)

    kernel = functools.partial(
        _kld_partial_kernel,
        block_rows=block_rows,
        n_inner=n_inner,
        rows_total=rows,
        need_mask=need_mask,
        scale=scale,
    )

    partials = pl.pallas_call(
        kernel,
        out_shape=jax.ShapeDtypeStruct((n_par * 8, _LANES), jnp.float32),
        grid_spec=pltpu.PrefetchScalarGridSpec(
            num_scalar_prefetch=0,
            grid=(n_par, n_inner),
            in_specs=[
                pl.BlockSpec((block_rows, _LANES), in_index_map),
                pl.BlockSpec((block_rows, _LANES), in_index_map),
            ],
            out_specs=pl.BlockSpec((8, _LANES), lambda p, k: (p, 0)),
            scratch_shapes=[pltpu.VMEM((block_rows, _LANES), jnp.float32)],
        ),
        compiler_params=pltpu.CompilerParams(
            dimension_semantics=("parallel", "arbitrary"),
            # 2 inputs x 2 buffers x ~2 MiB + f32 acc + out << 32 MiB; safe on
            # v5e/v6e (128 MiB physical) and v7x (64 MiB physical).
            vmem_limit_bytes=32 * 1024 * 1024,
        ),
        cost_estimate=pl.CostEstimate(
            flops=5 * n_elems,
            transcendentals=n_elems,
            bytes_accessed=2 * n_elems * itemsize + n_par * 8 * _LANES * 4,
        ),
    )(mu2, lv2)

    # Each slice broadcast its scaled partial into an (8,128) block; pick
    # element [0,0] of each and add (at most 2 scalars).
    per_slice = partials.reshape(n_par, 8, _LANES)[:, 0, 0]
    return jnp.sum(per_slice)


def _ref_kld(mu, logvar, reduction):
    kld = -0.5 * jnp.sum(1.0 + logvar - mu ** 2 - jnp.exp(logvar))
    if reduction == 'batch':
        kld = kld / mu.shape[0]
    elif reduction == 'mean':
        kld = kld / mu.size
    return kld


if __name__ == "__main__":
    key = jax.random.PRNGKey(0)
    k1, k2 = jax.random.split(key)

    # VAE latent statistics: mu/logvar of shape (batch=2, hidden=32).
    B, D = 2, 32
    mu = jax.random.normal(k1, (B, D), dtype=jnp.float32)
    logvar = jax.random.normal(k2, (B, D), dtype=jnp.float32)

    for reduction in ('sum', 'batch', 'mean'):
        got = kld_loss(mu, logvar, reduction=reduction)
        jax.block_until_ready(got)
        want = _ref_kld(mu, logvar, reduction)
        assert jnp.allclose(got, want, rtol=1e-5, atol=1e-5), (reduction, got, want)

    # Non-128-aligned shape: exercises zero-pad + in-kernel ragged-row masking.
    k3, k4 = jax.random.split(k1)
    mu_big = jax.random.normal(k3, (4, 3, 40, 33), dtype=jnp.float32)
    lv_big = jax.random.normal(k4, (4, 3, 40, 33), dtype=jnp.float32)
    got = kld_loss(mu_big, lv_big, reduction='batch')
    jax.block_until_ready(got)
    want = _ref_kld(mu_big, lv_big, 'batch')
    assert jnp.allclose(got, want, rtol=1e-4, atol=1e-4), (got, want)

    # 128-aligned shape with tiny forced blocks: exercises the multi-block
    # accumulation path and the 2-way parallel (megacore) outer axis.
    k5, k6 = jax.random.split(k3)
    mu_p = jax.random.normal(k5, (32, 1024), dtype=jnp.float32)
    lv_p = jax.random.normal(k6, (32, 1024), dtype=jnp.float32)
    got = kld_loss(mu_p, lv_p, reduction='mean', target_block_bytes=8192)
    jax.block_until_ready(got)
    want = _ref_kld(mu_p, lv_p, 'mean')
    assert jnp.allclose(got, want, rtol=1e-4, atol=1e-4), (got, want)

    print("KERNEL_OK")
</pallas_src>

<mosaic_0001>
module attributes {stable_mosaic.version = 11 : i64} {
  func.func @_kld_partial_kernel(%arg0: i32, %arg1: i32, %arg2: memref<1x128xf32, #tpu.memory_space<vmem>>, %arg3: memref<1x128xf32, #tpu.memory_space<vmem>>, %arg4: memref<8x128xf32, #tpu.memory_space<vmem>>, %arg5: memref<1x128xf32, #tpu.memory_space<vmem>>) attributes {dimension_semantics = [#tpu.dimension_semantics<parallel>, #tpu.dimension_semantics<arbitrary>], iteration_bounds = array<i64: 1, 1>, scalar_prefetch = 0 : i64, scratch_operands = 1 : i64, tpu.core_type = #tpu.core_type<tc>, window_params = [{transform_indices = @transform_0, window_bounds = array<i64: 1, 128>}, {transform_indices = @transform_1, window_bounds = array<i64: 1, 128>}, {transform_indices = @transform_2, window_bounds = array<i64: 8, 128>}]} {
    %c0_i32 = arith.constant 0 : i32
    %0 = arith.cmpi eq, %arg1, %c0_i32 : i32
    %1 = arith.extui %0 : i1 to i32
    %c0_i32_0 = arith.constant 0 : i32
    %2 = arith.cmpi ne, %1, %c0_i32_0 : i32
    scf.if %2 {
      %cst_10 = arith.constant 0.000000e+00 : f32
      %17 = vector.broadcast %cst_10 : f32 to vector<1x128xf32>
      %c0_11 = arith.constant 0 : index
      %c0_12 = arith.constant 0 : index
      %18 = vector.load %arg5[%c0_11, %c0_12] : memref<1x128xf32, #tpu.memory_space<vmem>>, vector<1x128xf32>
      tpu.vector_store %arg5[%c0_11, %c0_12], %17 {strides = array<i32>} : memref<1x128xf32, #tpu.memory_space<vmem>>, vector<1x128xf32>,
    } else {
    }
    %c0 = arith.constant 0 : index
    %c0_1 = arith.constant 0 : index
    %3 = vector.load %arg2[%c0, %c0_1] : memref<1x128xf32, #tpu.memory_space<vmem>>, vector<1x128xf32>
    %c0_2 = arith.constant 0 : index
    %c0_3 = arith.constant 0 : index
    %4 = vector.load %arg3[%c0_2, %c0_3] : memref<1x128xf32, #tpu.memory_space<vmem>>, vector<1x128xf32>
    %c0_4 = arith.constant 0 : index
    %c0_5 = arith.constant 0 : index
    %5 = vector.load %arg5[%c0_4, %c0_5] : memref<1x128xf32, #tpu.memory_space<vmem>>, vector<1x128xf32>
    %cst = arith.constant 1.000000e+00 : f32
    %6 = vector.broadcast %cst : f32 to vector<1x128xf32>
    %7 = arith.addf %6, %4 : vector<1x128xf32>
    %8 = arith.mulf %3, %3 : vector<1x128xf32>
    %9 = arith.subf %7, %8 : vector<1x128xf32>
    %10 = math.exp %4 : vector<1x128xf32>
    %11 = arith.subf %9, %10 : vector<1x128xf32>
    %12 = arith.addf %5, %11 : vector<1x128xf32>
    %c0_6 = arith.constant 0 : index
    %c0_7 = arith.constant 0 : index
    %13 = vector.load %arg5[%c0_6, %c0_7] : memref<1x128xf32, #tpu.memory_space<vmem>>, vector<1x128xf32>
    tpu.vector_store %arg5[%c0_6, %c0_7], %12 {strides = array<i32>} : memref<1x128xf32, #tpu.memory_space<vmem>>, vector<1x128xf32>,
    %c0_i32_8 = arith.constant 0 : i32
    %14 = arith.cmpi eq, %arg1, %c0_i32_8 : i32
    %15 = arith.extui %14 : i1 to i32
    %c0_i32_9 = arith.constant 0 : i32
    %16 = arith.cmpi ne, %15, %c0_i32_9 : i32
    scf.if %16 {
      %c0_10 = arith.constant 0 : index
      %c0_11 = arith.constant 0 : index
      %17 = vector.load %arg5[%c0_10, %c0_11] : memref<1x128xf32, #tpu.memory_space<vmem>>, vector<1x128xf32>
      %18 = vector.shape_cast %17 : vector<1x128xf32> to vector<1x1x128xf32>
      %cst_12 = arith.constant dense<0.000000e+00> : vector<1xf32>
      %19 = vector.multi_reduction <add>, %18, %cst_12 [1, 2] : vector<1x1x128xf32> to vector<1xf32>
      %20 = vector.shape_cast %19 : vector<1xf32> to vector<1x1x1xf32>
      %21 = vector.extract %20[0, 0, 0] : f32 from vector<1x1x1xf32>
      %cst_13 = arith.constant -5.000000e-01 : f32
      %22 = arith.mulf %21, %cst_13 : f32
      %23 = vector.broadcast %22 : f32 to vector<8x128xf32>
      %c0_14 = arith.constant 0 : index
      %c0_15 = arith.constant 0 : index
      %24 = vector.load %arg4[%c0_14, %c0_15] : memref<8x128xf32, #tpu.memory_space<vmem>>, vector<8x128xf32>
      tpu.vector_store %arg4[%c0_14, %c0_15], %23 {strides = array<i32>} : memref<8x128xf32, #tpu.memory_space<vmem>>, vector<8x128xf32>,
    } else {
    }
    return
  }
  func.func @transform_0(%arg0: i32, %arg1: i32) -> (i32, i32) {
    %c1_i32 = arith.constant 1 : i32
    %0 = arith.muli %arg0, %c1_i32 : i32
    %1 = arith.addi %0, %arg1 : i32
    %c0_i32 = arith.constant 0 : i32
    %2 = arith.minsi %1, %c0_i32 : i32
    %c0_i32_0 = arith.constant 0 : i32
    %c0_i32_1 = arith.constant 0 : i32
    return %2, %c0_i32_0 : i32, i32
  }
  func.func @transform_1(%arg0: i32, %arg1: i32) -> (i32, i32) {
    %c1_i32 = arith.constant 1 : i32
    %0 = arith.muli %arg0, %c1_i32 : i32
    %1 = arith.addi %0, %arg1 : i32
    %c0_i32 = arith.constant 0 : i32
    %2 = arith.minsi %1, %c0_i32 : i32
    %c0_i32_0 = arith.constant 0 : i32
    %c0_i32_1 = arith.constant 0 : i32
    return %2, %c0_i32_0 : i32, i32
  }
  func.func @transform_2(%arg0: i32, %arg1: i32) -> (i32, i32) {
    %c0_i32 = arith.constant 0 : i32
    %c0_i32_0 = arith.constant 0 : i32
    return %arg0, %c0_i32 : i32, i32
  }
}

</mosaic_0001>

<bundles_post_ra>
// kernel: tpu_custom_call.1
= control target key start
LH: loop header
LB: loop body
LE: loop exit
PB: predicated region body
PF: predicated region fallthrough
CT: control target
= control target key end

     0   :  { %7 = vsyncpa [#allocation4], 0  ;;  %s210_s0 = inlined_call_operand.hbm [shape: f32[1,128], index: 0, kind: input, shape index: {}]   ;;  %s211_s1 = inlined_call_operand.vmem [shape: f32[1,128], index: 1, kind: input, shape index: {}]   ;;  %s212_s2 = inlined_call_operand.hbm [shape: f32[8,128], index: 2, kind: output, shape index: {}]  }
   0x1   :  { %8 = vsyncpa [#allocation5], 0  ;;  %s165_s9 = smov [#allocation3]   ;;  %s117_s13 = scalar_lea.hbm %s210_s0, 16 }
   0x2   :  { %s20_s10 = sshll.u32 %s165_s9, 4  ;;  %p118_p0 = scmp.ne.s32.totalorder %s210_s0, %s117_s13  ;;  %s21_s10 = int_to_ptr.vmem [resolvable:$true] %s20_s10 }
   0x3   :  { %p121_p1 = scmp.lt.u32.totalorder %s117_s13, %s210_s0 }
   0x5   :  { %p123_p2 = pnand %p121_p1, %p118_p0 }
   0x7   :  { %126 = shalt.err (!%p123_p2)
}
   0x8   :  { %s127_s18 = scalar_lea.vmem %s21_s10, 16  ;;  %s131_s19 = scalar_lea.vmem %s21_s10, 32 }
   0x9   :  { %p128_p3 = scmp.ne.s32.totalorder %s21_s10, %s127_s18  ;;  %p132_p4 = scmp.lt.s32.totalorder %s21_s10, %s21_s10 }
   0xa   :  { %p133_p5 = scmp.lt.s32.totalorder %s131_s19, %s127_s18 }
   0xc   :  { %p134_p6 = por %p133_p5, %p132_p4 }
   0xe   :  { %p135_p7 = pnand %p134_p6, %p128_p3 }
  0x10   :  { %138 = shalt.err (!%p135_p7)
}
  0x11   :  { %23 = dma.hbm_to_vmem [thread:$0]  %s210_s0, 16, %s21_s10, [#allocation4]  }
  0x12   :  { %161 = dma.done.wait [#allocation4], 16  }
  0x13   :  { %162 = vsyncadd [#allocation4], 4294967280  ;;  %v166_v0 = vmov 0.0   ;;  %v62_v1 = vld [vmem:[%s211_s1] sm:$0x1]  ;;  %vm76_vm0 = vcmask 1040384  }
  0x14   :  { %60 = vst [vmem:[#allocation2] sm:$0x1] %v166_v0  ;;  %v67_v2 = vmul.f32 1.442695, %v62_v1  ;;  %v61_v3 = vld [vmem:[#allocation3] sm:$0x1] }
  0x15   :  { %v64_v4 = vadd.f32 1.0, %v62_v1  ;;  %v65_v5 = vmul.f32 %v61_v3, %v61_v3  ;;  %s167_s0 = smov [#allocation6]  }
  0x16   :  { %115 = vpow2.f32 %v67_v2  ;;  %s96_s1 = sshll.u32 %s167_s0, 4  ;;  %s97_s1 = int_to_ptr.vmem [resolvable:$true] %s96_s1 }
  0x17   :  { %v66_v6 = vsub.f32 %v64_v4, %v65_v5  ;;  %s139_s26 = scalar_lea.vmem %s97_s1, 128  ;;  %p144_p9 = scmp.lt.s32.totalorder %s97_s1, %s97_s1 }
  0x18   :  { %p140_p8 = scmp.ne.s32.totalorder %s97_s1, %s139_s26  ;;  %p145_p10 = scmp.lt.s32.totalorder %s139_s26, %s139_s26 }
  0x1a   :  { %p146_p11 = por %p145_p10, %p144_p9 }
  0x1b   :  { %v63_v8 = vld [vmem:[#allocation2] sm:$0x1] }
  0x1c   :  { %p147_p12 = pnand %p146_p11, %p140_p8 }
  0x20   :  { %v116_v7 = vpop.eup %115 }
  0x21   :  { %v69_v9 = vsub.f32 %v66_v6, %v116_v7 }
  0x23   :  { %v70_v10 = vadd.f32 %v69_v9, %v63_v8 }
  0x25   :  { %71 = vst [vmem:[#allocation2] sm:$0x1] %v70_v10 }
  0x2c   :  { %v75_v11 = vld [vmem:[#allocation2] sm:$0x1] }
  0x2d   :  { %v77_v12 = vsel %vm76_vm0, %v75_v11, 0.0 }
  0x2e   :  { %78 = vadd.xlane.f32.xlu0 %v77_v12 }
  0xbb   :  { %v79_v13 = vpop.xlane.xlu0 %78 }
  0xbc   :  { %v80_v14 = vrot.slane %v79_v13, 4 }
  0xbe   :  { %v81_v15 = vadd.f32 %v80_v14, %v79_v13 }
  0xc0   :  { %v82_v16 = vrot.slane %v81_v15, 2 }
  0xc2   :  { %v83_v17 = vadd.f32 %v82_v16, %v81_v15 }
  0xc4   :  { %v84_v18 = vrot.slane %v83_v17, 1 }
  0xc6   :  { %v85_v19 = vadd.f32 %v84_v18, %v83_v17 }
  0xc8   :  { %110 = vpush %v85_v19 }
  0xf9   :  { %s111_s24 = spop %110 }
  0xfa   :  { %s87_s25 = smul.f32 -0.5, %s111_s24 }
  0xfc   :  { %v88_v20 = vstv %s87_s25 }
  0xfd   :  { %89 = vst [vmem:[#allocation6] sm:$0xff] %v88_v20 }
  0xfe   :  { %150 = shalt.err (!%p147_p12)
}
  0xff   :  { %s151_s29 = scalar_lea.hbm %s212_s2, 128 }
 0x100   :  { %p152_p13 = scmp.ne.s32.totalorder %s212_s2, %s151_s29  ;;  %p155_p0 = scmp.lt.u32.totalorder %s151_s29, %s212_s2 }
 0x102   :  { %p157_p1 = pnand %p155_p0, %p152_p13 }
 0x104   :  { %160 = shalt.err (!%p157_p1)
}
 0x105   :  { %99 = dma.vmem_to_hbm [thread:$0]  %s97_s1, 128, %s212_s2, [#allocation5]  }
 0x106   :  { %163 = dma.done.wait [#allocation5], 128  }
 0x107   :  { %164 = vsyncadd [#allocation5], 4294967168 }
 0x108   :  { %103 = vsyncpa [#allocation4], 1 }
 0x109   :  { %104 = vsyncpa [#allocation5], 1 }

</bundles_post_ra>
